<compile_context>
chip_gen: v7x
topology: tpu7x:2x2x1
jax: 0.10.0
libtpu: 0.0.40
codegen_flags: <defaults>
</compile_context>

<pallas_src>
import functools

import jax
import jax.numpy as jnp
from jax.experimental import pallas as pl
from jax.experimental.pallas import tpu as pltpu

SEMANTIC_DIM = 128
CHANNEL_DIM = 128


def _channel_encoder_kernel(x_ref, w_ref, b_ref, o_ref, *, precision):
    # x_ref: (tb, D_in)  w_ref: (D_in, D_out)  b_ref: (1, D_out)  o_ref: (tb, D_out)
    y = jnp.dot(x_ref[...], w_ref[...],
                preferred_element_type=jnp.float32, precision=precision)
    y = y + b_ref[...].astype(jnp.float32)      # bias add + tanh in f32 (v5e-safe)
    o_ref[...] = jnp.tanh(y).astype(o_ref.dtype)


def _round_up(v, m):
    return ((v + m - 1) // m) * m


@functools.partial(jax.jit, static_argnames=("tile_b", "min_grid_steps", "precision"))
def channel_encoder(x, w, b, *, tile_b=4096, min_grid_steps=4, precision=None):
    """tanh(x @ w + b)  ==  nn.Sequential(nn.Linear(D_in, D_out), nn.Tanh()).

    x: [B, D_in], w: [D_in, D_out] (transpose of nn.Linear's [out, in] weight),
    b: [D_out].  Returns [B, D_out] in x's dtype.

    Pass bf16 x / w (produced upstream, not cast here) to halve streaming HBM
    bytes on v6e/v7x; the bias add, tanh and accumulation stay in f32.
    Arbitrary (ragged) B is handled by Pallas partial-block clipping — no pads,
    no output slicing.
    """
    B, D_in = x.shape
    D_out = w.shape[1]
    out_dtype = x.dtype

    if precision is None:
        precision = (jax.lax.Precision.HIGHEST
                     if x.dtype == jnp.float32 else jax.lax.Precision.DEFAULT)

    itemsize = jnp.dtype(x.dtype).itemsize
    row_align = {4: 8, 2: 16, 1: 32}.get(itemsize, 8)   # native sublane packing

    # Clamp the tile: sublane-aligned, no larger than needed, and keep the grid
    # at >= min_grid_steps steps when B allows so both v7x TensorCores get work.
    tile_cap = _round_up(pl.cdiv(B, min_grid_steps), row_align)
    tile_b = max(row_align, min(_round_up(tile_b, row_align), tile_cap))
    grid = pl.cdiv(B, tile_b)

    b2 = b.reshape(1, D_out).astype(jnp.float32)

    bytes_accessed = (B * D_in * itemsize            # streamed x
                      + D_in * D_out * jnp.dtype(w.dtype).itemsize
                      + D_out * 4                    # bias
                      + B * D_out * jnp.dtype(out_dtype).itemsize)  # output

    out = pl.pallas_call(
        functools.partial(_channel_encoder_kernel, precision=precision),
        out_shape=jax.ShapeDtypeStruct((B, D_out), out_dtype),
        grid_spec=pltpu.PrefetchScalarGridSpec(
            num_scalar_prefetch=0,
            grid=(grid,),
            in_specs=[
                pl.BlockSpec((tile_b, D_in), lambda i: (i, 0)),   # streaming x tile
                pl.BlockSpec((D_in, D_out), lambda i: (0, 0)),    # resident weight
                pl.BlockSpec((1, D_out), lambda i: (0, 0)),       # resident bias row
            ],
            out_specs=pl.BlockSpec((tile_b, D_out), lambda i: (i, 0)),
        ),
        compiler_params=pltpu.CompilerParams(
            dimension_semantics=("parallel",),        # batch axis shards across TCs
            vmem_limit_bytes=32 * 1024 * 1024,        # headroom if tile_b is raised
        ),
        cost_estimate=pl.CostEstimate(
            flops=2 * B * D_in * D_out,
            transcendentals=B * D_out,
            bytes_accessed=bytes_accessed,
        ),
    )(x, w, b2)
    return out


if __name__ == "__main__":
    key = jax.random.PRNGKey(0)
    k_x, k_w, k_b = jax.random.split(key, 3)

    # Small, ragged batch to exercise the partial-last-block path.
    B = 10
    x = jax.random.normal(k_x, (B, SEMANTIC_DIM), dtype=jnp.float32)

    # Deterministic init mimicking nn.Linear's uniform(-1/sqrt(fan_in), +...).
    bound = 1.0 / (SEMANTIC_DIM ** 0.5)
    w = jax.random.uniform(k_w, (SEMANTIC_DIM, CHANNEL_DIM), dtype=jnp.float32,
                           minval=-bound, maxval=bound)
    b = jax.random.uniform(k_b, (CHANNEL_DIM,), dtype=jnp.float32,
                           minval=-bound, maxval=bound)

    ref = jnp.tanh(x @ w + b)

    # f32 path (exact parity with the PyTorch reference).
    out = jax.block_until_ready(channel_encoder(x, w, b))
    assert out.shape == (B, CHANNEL_DIM)
    assert out.dtype == jnp.float32
    assert jnp.allclose(out, ref, atol=1e-5, rtol=1e-5)

    # bf16 streaming path (inputs already bf16 upstream; looser tolerance).
    out_bf16 = jax.block_until_ready(
        channel_encoder(x.astype(jnp.bfloat16), w.astype(jnp.bfloat16), b))
    assert out_bf16.shape == (B, CHANNEL_DIM)
    assert out_bf16.dtype == jnp.bfloat16
    assert jnp.allclose(out_bf16.astype(jnp.float32), ref, atol=2e-2, rtol=2e-2)

    print("KERNEL_OK")
</pallas_src>

<mosaic_0001>
module attributes {stable_mosaic.version = 11 : i64} {
  func.func @_channel_encoder_kernel(%arg0: i32, %arg1: memref<8x128xf32, #tpu.memory_space<vmem>>, %arg2: memref<128x128xf32, #tpu.memory_space<vmem>>, %arg3: memref<1x128xf32, #tpu.memory_space<vmem>>, %arg4: memref<8x128xf32, #tpu.memory_space<vmem>>) attributes {dimension_semantics = [#tpu.dimension_semantics<parallel>], iteration_bounds = array<i64: 2>, scalar_prefetch = 0 : i64, scratch_operands = 0 : i64, tpu.core_type = #tpu.core_type<tc>, window_params = [{transform_indices = @transform_0, window_bounds = array<i64: 8, 128>}, {pipeline_mode = #tpu.pipeline_mode<synchronous>, transform_indices = @transform_1, window_bounds = array<i64: 128, 128>}, {pipeline_mode = #tpu.pipeline_mode<synchronous>, transform_indices = @transform_2, window_bounds = array<i64: 1, 128>}, {transform_indices = @transform_3, window_bounds = array<i64: 8, 128>}]} {
    %c0 = arith.constant 0 : index
    %c0_0 = arith.constant 0 : index
    %0 = vector.load %arg1[%c0, %c0_0] : memref<8x128xf32, #tpu.memory_space<vmem>>, vector<8x128xf32>
    %c0_1 = arith.constant 0 : index
    %c0_2 = arith.constant 0 : index
    %1 = vector.load %arg2[%c0_1, %c0_2] : memref<128x128xf32, #tpu.memory_space<vmem>>, vector<128x128xf32>
    %cst = arith.constant dense<0.000000e+00> : vector<8x128xf32>
    %2 = tpu.matmul %0, %1, %cst {dimension_numbers = #tpu.dot_dimension_numbers<[1], [0], [0], [1], [0, 0, 1, 1], [], []>, precision = #tpu.contract_precision<fp32>} : vector<8x128xf32>, vector<128x128xf32>, vector<8x128xf32> -> vector<8x128xf32>
    %c0_3 = arith.constant 0 : index
    %c0_4 = arith.constant 0 : index
    %3 = vector.load %arg3[%c0_3, %c0_4] : memref<1x128xf32, #tpu.memory_space<vmem>>, vector<1x128xf32>
    %4 = vector.broadcast %3 : vector<1x128xf32> to vector<8x128xf32>
    %5 = arith.addf %2, %4 : vector<8x128xf32>
    %6 = math.tanh %5 : vector<8x128xf32>
    %c0_5 = arith.constant 0 : index
    %c0_6 = arith.constant 0 : index
    %7 = vector.load %arg4[%c0_5, %c0_6] : memref<8x128xf32, #tpu.memory_space<vmem>>, vector<8x128xf32>
    tpu.vector_store %arg4[%c0_5, %c0_6], %6 {strides = array<i32>} : memref<8x128xf32, #tpu.memory_space<vmem>>, vector<8x128xf32>,
    return
  }
  func.func @transform_0(%arg0: i32) -> (i32, i32) {
    %c0_i32 = arith.constant 0 : i32
    %c0_i32_0 = arith.constant 0 : i32
    return %arg0, %c0_i32 : i32, i32
  }
  func.func @transform_1(%arg0: i32) -> (i32, i32) {
    %c0_i32 = arith.constant 0 : i32
    %c0_i32_0 = arith.constant 0 : i32
    %c0_i32_1 = arith.constant 0 : i32
    return %c0_i32, %c0_i32_0 : i32, i32
  }
  func.func @transform_2(%arg0: i32) -> (i32, i32) {
    %c0_i32 = arith.constant 0 : i32
    %c0_i32_0 = arith.constant 0 : i32
    %c0_i32_1 = arith.constant 0 : i32
    return %c0_i32, %c0_i32_0 : i32, i32
  }
  func.func @transform_3(%arg0: i32) -> (i32, i32) {
    %c0_i32 = arith.constant 0 : i32
    %c0_i32_0 = arith.constant 0 : i32
    return %arg0, %c0_i32 : i32, i32
  }
}

</mosaic_0001>

<bundles_post_ra>
// kernel: channel_encoder.1
= control target key start
LH: loop header
LB: loop body
LE: loop exit
PB: predicated region body
PF: predicated region fallthrough
CT: control target
= control target key end

     0   :  { %8 = vsyncpa [#allocation3], 0  ;;  %s2118_s0 = inlined_call_operand.hbm [shape: f32[10,128], index: 0, kind: input, shape index: {}]   ;;  %s2119_s1 = inlined_call_operand.hbm [shape: f32[128,128], index: 1, kind: input, shape index: {}]   ;;  %s2120_s2 = inlined_call_operand.vmem [shape: f32[1,128], index: 2, kind: input, shape index: {}]   ;;  %s2121_s3 = inlined_call_operand.hbm [shape: f32[10,128], index: 3, kind: output, shape index: {}]  }
   0x1   :  { %10 = vsyncpa [#allocation3 + $0x1], 0 }
   0x2   :  { %11 = vsyncpa [#allocation6], 0 }
   0x3   :  { %12 = vsyncpa [#allocation4], 0 }
   0x4   :  { %14 = vsyncpa [#allocation4 + $0x1], 0  ;;  %s1665_s12 = smov 0   ;;  %s1667_s13 = smov 0  }
   0x5   :  { %s1669_s14 = smov 0   ;;  %s1671_s15 = smov 0  }
   0x6 LB: > { %s1686_s16 = sadd.s32 4294967295, %s1635_s15   ;;  %s962_s17 = sadd.s32 4294967294, %s1635_s15   ;;  %s1635_s15 = sphi %s1671_s15, %s2141_s15   ;;  %s1631_s14 = sphi %s1669_s14, %s2140_s14   ;;  %s1627_s13 = sphi %s1667_s13, %s2139_s13   ;;  %s1623_s12 = sphi %s1665_s12, %s2138_s12  }
   0x7   : > { %p40_p0 = scmp.ne.s32.totalorder %s1627_s13, %s1623_s12  ;;  %p2122_p1 = scmp.eq.s32.totalorder %s1686_s16, 0 }
   0x8   : > { %p112_p3 = scmp.eq.s32.totalorder %s962_s17, 1  ;;  %p963_p5 = scmp.ge.s32.totalorder %s1635_s15, 1 }
   0x9   : > { %p1695_p4 = por %p2122_p1, %p40_p0  ;;  %p119_p7 = scmp.lt.s32.totalorder %s1635_s15, 3 }
   0xa   : > { %p1700_p6 = por %p112_p3, %p40_p0  ;;  %s1637_s21 = smov [#allocation5]  }
   0xb   : > { %s2125_s18 = scalar_select %p1695_p4, 1, 0 }
   0xc   : > { %s2126_s19 = scalar_select %p1700_p6, 1, 0 }
   0xd   : > { %p1705_p8 = pnand %p963_p5, %p119_p7  ;;  %s131_s22 = sshll.u32 %s1637_s21, 4  ;;  %s1709_s22 = int_to_ptr.vmem [resolvable:$true] %s131_s22 }
   0xe   : > { %s1721_s24 = sadd.s32 1, %s1635_s15   ;;  %s27_s25 = sadd.s32 1, %s1631_s14 }
   0xf   : > { %s2127_s20 = scalar_select %p1705_p8, 1, 0 }
  0x10   : > { %p1451_p9 = pneg %p1705_p8  ;;  %s24_s26 = ssub.s32 %s1635_s15, %s1721_s24 }
  0x11   : > { %s1507_s29 = scalar_lea.hbm %s2119_s1, 2048 }
  0x12   : > { %p1716_p11 = pnand %p1451_p9, %p2122_p1  ;;  %p1508_p12 = scmp.ne.s32.totalorder %s2119_s1, %s1507_s29 }
  0x13   : > { %p1514_p5 = scmp.lt.u32.totalorder %s1507_s29, %s2119_s1 }
  0x14   : > { %p1509_p13 = pneg %p1716_p11 }
  0x16   : > { %p1510_p0 = pnand %p1509_p13, %p1508_p12 }
  0x18   : > { %p1511_p3 = pneg %p1510_p0 }
  0x1a   : > { %p1516_p7 = pnand %p1514_p5, %p1511_p3 }
  0x1c   : > { %1519 = shalt.err (!%p1516_p7)
}
  0x1d   : > { %s1520_s7 = scalar_lea.vmem %s1709_s22, 2048  ;;  %p1528_p2 = scmp.lt.s32.totalorder %s1709_s22, %s1709_s22 }
  0x1e   : > { %p1521_p9 = scmp.ne.s32.totalorder %s1709_s22, %s1520_s7  ;;  %p1529_p6 = scmp.lt.s32.totalorder %s1520_s7, %s1520_s7 }
  0x20   : > { %p1523_p10 = pnand %p1521_p9, %p1509_p13  ;;  %p1530_p4 = por %p1529_p6, %p1528_p2 }
  0x22   : > { %p1524_p1 = pneg %p1523_p10 }
  0x24   : > { %p1531_p8 = pnand %p1530_p4, %p1524_p1 }
  0x26   : > { %1534 = shalt.err (!%p1531_p8)
}
  0x27   : > { %s1638_s8 = smov 128   ;;  %s1639_s9 = smov 8  }
  0x28   : > { %1454 = dma.hbm_to_vmem [thread:$0]  (!%p1716_p11), %s2119_s1, 2048, %s1709_s22, [#allocation6], %s1638_s8, %s1638_s8, %s1639_s9  }
  0x29   : > { %p25_p2 = scmp.eq.s32.totalorder %s24_s26, 0  ;;  %p34_p1 = scmp.ne.s32.totalorder %s1631_s14, %s1627_s13 }
  0x2a   : > { %p35_p4 = scmp.eq.s32.totalorder %s1635_s15, 0  ;;  %p1464_p6 = scmp.lt.s32.totalorder %s1635_s15, 2 }
  0x2b   : > { %s1752_s17 = scalar_select %p25_p2, %s1631_s14, %s27_s25  }
  0x2c   : > { %p36_p8 = por %p35_p4, %p34_p1  ;;  %p2129_p10 = scmp.eq.s32.totalorder %s1686_s16, 1 }
  0x2d   : > { %s148_s27 = sand.u32 1, %s1631_s14   ;;  %s967_s28 = sshll.u32 %s1635_s15, 7 }
  0x2e   : > { %p1756_p12 = por %p2129_p10, %p34_p1  ;;  %s966_s29 = sshll.u32 %s148_s27, 3 }
  0x2f   : > { %s1765_s4 = scalar_lea.hbm %s2118_s0, %s967_s28  ;;  %s152_s22 = scalar_lea.vmem [#allocation2], %s966_s29 }
  0x30   : > { %s159_s25 = sshll.u32 %s152_s22, 4  ;;  %p1767_p11 = pnand %p1464_p6, %p36_p8  ;;  %s1771_s25 = int_to_ptr.vmem [resolvable:$true] %s159_s25 }
  0x31   : > { %s149_s5 = scalar_lea.sflag [#allocation3], %s148_s27  ;;  %s1535_s6 = scalar_lea.hbm %s1765_s4, 128 }
  0x32   : > { %p1536_p13 = scmp.ne.s32.totalorder %s1765_s4, %s1535_s6  ;;  %p1537_p0 = pneg %p1767_p11 }
  0x33   : > { %s1540_s9 = scalar_lea.hbm %s2118_s0, 256  ;;  %p1541_p7 = scmp.lt.u32.totalorder %s1765_s4, %s2118_s0 }
  0x34   : > { %p1538_p3 = pnand %p1537_p0, %p1536_p13  ;;  %p1542_p9 = scmp.lt.u32.totalorder %s1540_s9, %s1535_s6 }
  0x35   : > { %p1544_p1 = scmp.lt.u32.totalorder %s1535_s6, %s1765_s4 }
  0x36   : > { %p1539_p5 = pneg %p1538_p3  ;;  %p1543_p2 = por %p1542_p9, %p1541_p7 }
  0x38   : > { %p1545_p4 = por %p1544_p1, %p1543_p2 }
  0x3a   : > { %p1546_p6 = pnand %p1545_p4, %p1539_p5 }
  0x3c   : > { %1549 = shalt.err (!%p1546_p6)
}
  0x3d   : > { %s1550_s27 = scalar_lea.vmem %s1771_s25, 128  ;;  %s1640_s28 = smov [#allocation2]  }
  0x3e   : > { %p1551_p8 = scmp.ne.s32.totalorder %s1771_s25, %s1550_s27  ;;  %s1555_s29 = sshll.u32 %s1640_s28, 4  ;;  %s1556_s29 = int_to_ptr.vmem [resolvable:$false] %s1555_s29 }
  0x3f   : > { %s1557_s23 = scalar_lea.vmem %s1556_s29, 256  ;;  %p1558_p3 = scmp.lt.s32.totalorder %s1771_s25, %s1556_s29 }
  0x40   : > { %p1553_p10 = pnand %p1551_p8, %p1537_p0  ;;  %p1559_p7 = scmp.lt.s32.totalorder %s1557_s23, %s1550_s27 }
  0x42   : > { %p1554_p13 = pneg %p1553_p10  ;;  %p1560_p9 = por %p1559_p7, %p1558_p3 }
  0x44   : > { %p1561_p2 = pnand %p1560_p9, %p1554_p13 }
  0x46   : > { %1564 = shalt.err (!%p1561_p2)
}
  0x47   : > { %1458 = dma.hbm_to_vmem [thread:$0]  (!%p1767_p11), %s1765_s4, 128, %s1771_s25, %s149_s5  }
  0x48   : > { %p2132_p5 = scmp.ne.s32.totalorder %s2127_s20, 0 }
  0x49   : > { %s1801_s30 = sand.u32 (!%p2132_p5), 1, %s1627_s13   ;;  %p2133_p0 = scmp.ne.s32.totalorder (!%p2132_p5), %s2125_s18, 0 }
  0x4a   : > { %168 = sbr.rel (%p2132_p5) target bundleno = 426 (0x1aa), region = 32  ;;  %s969_s22 = sshll.u32 (!%p2132_p5), %s1801_s30, 3 }
  0x4b   : > { %s171_s6 = scalar_lea.sflag (!%p2132_p5), [#allocation3], %s1801_s30  ;;  %s1807_s7 = scalar_lea.vmem (!%p2132_p5), [#allocation2], %s969_s22 }
  0x51   : > { %1610 = dma.done.wait (%p2133_p0), %s171_s6, 128  }
  0x52   : > { %1612 = vsyncadd (%p2133_p0), %s171_s6, 4294967168  ;;  %p2134_p11 = scmp.eq.s32.totalorder %s1686_s16, 0 }
  0x54   : > { %1614 = dma.done.wait (%p2134_p11), [#allocation6], 2048   ;;  %p2135_p1 = pmov %p2134_p11 }
  0x55   : > { %v1641_v0 = vmov 0.0|0.0   ;;  %vm1642_vm0 = vmmov 0   ;;  %v1643_v1 = vmov 0.0   ;;  %v202_v2 = vld [vmem:[#allocation5] sm:$0xff]  ;;  %v203_v3 = vld [vmem:[#allocation5 + $0x8] sm:$0xff]  ;;  %v204_v4 = vld [vmem:[#allocation5 + $0x10] sm:$0xff] }
  0x56   : > { %1616 = vsyncadd (%p2135_p1), [#allocation6], 4294965248  ;;  %1289 = vmatprep.subr.bf16.mxu1 %v1641_v0  ;;  %1361 = vmatprep.subr.bf16.mxu0 %v1641_v0  ;;  %v226_v5 = vand.u32 4294901760, %v202_v2  ;;  %v229_v6 = vand.u32 4294901760, %v203_v3  ;;  %v205_v7 = vld [vmem:[#allocation5 + $0x18] sm:$0xff]  ;;  %v232_v8 = vand.u32 4294901760, %v204_v4 }
  0x57   : > { %1111 = vmatprep.mubr.msk.f32.mxu1 %vm1642_vm0, %v1643_v1  ;;  %1216 = vmatprep.mubr.msk.f32.mxu0 %vm1642_vm0, %v1643_v1  ;;  %v235_v9 = vand.u32 4294901760, %v205_v7  ;;  %v206_v10 = vld [vmem:[#allocation5 + $0x20] sm:$0xff]  ;;  %v207_v11 = vld [vmem:[#allocation5 + $0x28] sm:$0xff]  ;;  %v208_v16 = vld [vmem:[#allocation5 + $0x30] sm:$0xff]  ;;  %s974_s4 = sshll.u32 %s1686_s16, 7  ;;  %s200_s25 = scalar_lea.vmem [#allocation7], %s969_s22 }
  0x58   : > { %v1823_v12 = vpack.c.bf16 %v229_v6, %v226_v5  ;;  %v238_v14 = vand.u32 4294901760, %v206_v10  ;;  %v241_v15 = vand.u32 4294901760, %v207_v11  ;;  %v209_v17 = vld [vmem:[#allocation5 + $0x38] sm:$0xff]  ;;  %v244_v19 = vand.u32 4294901760, %v208_v16  ;;  %v1837_v21 = vld [vmem:[#allocation5 + $0x40] sm:$0xff]  ;;  %v1839_v22 = vld [vmem:[#allocation5 + $0x48] sm:$0xff]  ;;  %s2074_s9 = scalar_lea.hbm %s2121_s3, %s974_s4 }
  0x59   : > { %v1827_v13 = vpack.c.bf16 %v235_v9, %v232_v8  ;;  %v247_v20 = vand.u32 4294901760, %v209_v17  ;;  %v250_v24 = vand.u32 4294901760, %v1837_v21  ;;  %v253_v25 = vand.u32 4294901760, %v1839_v22  ;;  %v201_v26 = vld [vmem:[%s1807_s7] sm:$0xff]  ;;  %v1866_v35 = vld [vmem:[#allocation5 + $0x60] sm:$0xff]  ;;  %v1870_v36 = vld [vmem:[#allocation5 + $0x68] sm:$0xff] }
  0x5a   : > { %1291 = vmatpush3.bf16.msra.mxu1 %v1823_v12  ;;  %1363 = vmatpush3.bf16.msra.mxu0 %v1823_v12  ;;  %v1833_v18 = vpack.c.bf16 %v241_v15, %v238_v14  ;;  %v1850_v27 = vld [vmem:[#allocation5 + $0x50] sm:$0xff]  ;;  %v1852_v28 = vld [vmem:[#allocation5 + $0x58] sm:$0xff]  ;;  %v1854_v29 = vsub.f32 %v202_v2, %v226_v5  ;;  %v1856_v30 = vand.u32 4294901760, %v201_v26  ;;  %v1858_v31 = vsub.f32 %v203_v3, %v229_v6  ;;  %s882_s26 = sshll.u32 %s200_s25, 4  ;;  %s869_s10 = scalar_lea.sflag [#allocation4], %s1801_s30  ;;  %s2076_s26 = int_to_ptr.vmem [resolvable:$true] %s882_s26 }
  0x5b   : > { %1292 = vmatprep.subr.bf16.mxu1 %v1641_v0  ;;  %1364 = vmatprep.subr.bf16.mxu0 %v1641_v0  ;;  %v1843_v23 = vpack.c.bf16 %v247_v20, %v244_v19  ;;  %v1862_v32 = vpack.c.bf16 %v253_v25, %v250_v24  ;;  %v256_v33 = vand.u32 4294901760, %v1850_v27  ;;  %v259_v34 = vand.u32 4294901760, %v1852_v28  ;;  %v1889_v43 = vld [vmem:[#allocation5 + $0x70] sm:$0xff]  ;;  %v1891_v44 = vld [vmem:[#allocation5 + $0x78] sm:$0xff]  ;;  %s1565_s11 = scalar_lea.vmem %s2076_s26, 128  ;;  %s1644_s16 = smov [#allocation7]  }
  0x5c   : > { %v1872_v37 = vsub.f32 %v204_v4, %v232_v8  ;;  %v1874_v38 = vsub.f32 %v205_v7, %v235_v9  ;;  %v262_v39 = vand.u32 4294901760, %v1866_v35  ;;  %v1878_v40 = vsub.f32 %v201_v26, %v1856_v30  ;;  %p1566_p4 = scmp.ne.s32.totalorder %s2076_s26, %s1565_s11  ;;  %s1569_s27 = sshll.u32 %s1644_s16, 4  ;;  %s1570_s27 = int_to_ptr.vmem [resolvable:$false] %s1569_s27 }
  0x5d   : > { %v1886_v41 = vpack.c.bf16 %v259_v34, %v256_v33  ;;  %v265_v42 = vand.u32 4294901760, %v1870_v36  ;;  %v319_v45 = vand.u32 4294901760, %v1854_v29  ;;  %v326_v46 = vand.u32 4294901760, %v1858_v31  ;;  %s1571_s28 = scalar_lea.vmem %s1570_s27, 256  ;;  %p1572_p10 = scmp.lt.s32.totalorder %s2076_s26, %s1570_s27 }
  0x5e   : > { %1294 = vmatpush3.bf16.msra.mxu1 %v1827_v13  ;;  %1366 = vmatpush3.bf16.msra.mxu0 %v1827_v13  ;;  %v1897_v47 = vsub.f32 %v206_v10, %v238_v14  ;;  %v1899_v48 = vsub.f32 %v207_v11, %v241_v15  ;;  %v268_v49 = vand.u32 4294901760, %v1889_v43  ;;  %v271_v50 = vand.u32 4294901760, %v1891_v44  ;;  %p1567_p6 = pnand %p1566_p4, %p1756_p12  ;;  %p1573_p13 = scmp.lt.s32.totalorder %s1571_s28, %s1565_s11 }
  0x5f   : > { %1295 = vmatprep.subr.bf16.mxu1 %v1641_v0  ;;  %1367 = vmatprep.subr.bf16.mxu0 %v1641_v0  ;;  %v308_v51 = vand.u32 4294901760, %v1878_v40  ;;  %v333_v52 = vand.u32 4294901760, %v1872_v37  ;;  %v1911_v53 = vpack.c.bf16 %v265_v42, %v262_v39  ;;  %v320_v54 = vsub.f32 %v1854_v29, %v319_v45 }
  0x60   : > { %v327_v55 = vsub.f32 %v1858_v31, %v326_v46  ;;  %v340_v56 = vand.u32 4294901760, %v1874_v38  ;;  %v1918_v57 = vsub.f32 %v208_v16, %v244_v19  ;;  %v1920_v58 = vsub.f32 %v209_v17, %v247_v20  ;;  %p1568_p8 = pneg %p1567_p6  ;;  %p1574_p3 = por %p1573_p13, %p1572_p10 }
  0x61   : > { %v309_v59 = vsub.f32 %v1878_v40, %v308_v51  ;;  %v334_v60 = vsub.f32 %v1872_v37, %v333_v52  ;;  %v347_v61 = vand.u32 4294901760, %v1897_v47  ;;  %v354_v62 = vand.u32 4294901760, %v1899_v48 }
  0x62   : > { %1297 = vmatpush3.bf16.msra.mxu1 %v1833_v18  ;;  %1369 = vmatpush3.bf16.msra.mxu0 %v1833_v18  ;;  %v1932_v63 = vpack.c.bf16 %v271_v50, %v268_v49  ;;  %v321_v2 = vand.u32 4294901760, %v320_v54  ;;  %v328_v3 = vand.u32 4294901760, %v327_v55  ;;  %v341_v4 = vsub.f32 %v1874_v38, %v340_v56  ;;  %p1575_p7 = pnand %p1574_p3, %p1568_p8 }
  0x63   : > { %1298 = vmatprep.subr.bf16.mxu1 %v1641_v0  ;;  %1370 = vmatprep.subr.bf16.mxu0 %v1641_v0  ;;  %v1938_v5 = vsub.f32 %v1837_v21, %v250_v24  ;;  %v1941_v6 = vsub.f32 %v1839_v22, %v253_v25  ;;  %v1386_v7 = vpack.c.bf16 %v326_v46, %v319_v45  ;;  %v310_v8 = vand.u32 4294901760, %v309_v59 }
  0x64   : > { %v335_v9 = vand.u32 4294901760, %v334_v60  ;;  %v348_v10 = vsub.f32 %v1897_v47, %v347_v61  ;;  %v355_v11 = vsub.f32 %v1899_v48, %v354_v62  ;;  %v1314_v14 = vpack.c.bf16 %v328_v3, %v321_v2 }
  0x65   : > { %v342_v15 = vand.u32 4294901760, %v341_v4  ;;  %v361_v16 = vand.u32 4294901760, %v1918_v57  ;;  %v368_v17 = vand.u32 4294901760, %v1920_v58  ;;  %v1954_v19 = vsub.f32 %v1850_v27, %v256_v33 }
  0x66   : > { %1300 = vmatpush3.bf16.msra.mxu1 %v1843_v23  ;;  %1372 = vmatpush3.bf16.msra.mxu0 %v1843_v23  ;;  %v1959_v20 = vsub.f32 %v1852_v28, %v259_v34  ;;  %v1389_v21 = vpack.c.bf16 %v340_v56, %v333_v52  ;;  %v349_v22 = vand.u32 4294901760, %v348_v10  ;;  %v356_v24 = vand.u32 4294901760, %v355_v11 }
  0x67   : > { %1301 = vmatprep.subr.bf16.mxu1 %v1641_v0  ;;  %1373 = vmatprep.subr.bf16.mxu0 %v1641_v0  ;;  %v375_v25 = vand.u32 4294901760, %v1938_v5  ;;  %v1317_v26 = vpack.c.bf16 %v342_v15, %v335_v9  ;;  %v362_v45 = vsub.f32 %v1918_v57, %v361_v16  ;;  %v369_v27 = vsub.f32 %v1920_v58, %v368_v17 }
  0x68   : > { %v382_v33 = vand.u32 4294901760, %v1941_v6  ;;  %v1970_v28 = vsub.f32 %v1866_v35, %v262_v39  ;;  %v1975_v34 = vsub.f32 %v1870_v36, %v265_v42  ;;  %v1320_v46 = vpack.c.bf16 %v356_v24, %v349_v22 }
  0x69   : > { %v376_v52 = vsub.f32 %v1938_v5, %v375_v25  ;;  %v389_v54 = vand.u32 4294901760, %v1954_v19  ;;  %v363_v35 = vand.u32 4294901760, %v362_v45  ;;  %v370_v39 = vand.u32 4294901760, %v369_v27 }
  0x6a   : > { %1303 = vmatpush3.bf16.msra.mxu1 %v1862_v32  ;;  %1375 = vmatpush3.bf16.msra.mxu0 %v1862_v32  ;;  %v383_v55 = vsub.f32 %v1941_v6, %v382_v33  ;;  %v396_v36 = vand.u32 4294901760, %v1959_v20  ;;  %v1990_v42 = vsub.f32 %v1889_v43, %v268_v49  ;;  %v1995_v56 = vsub.f32 %v1891_v44, %v271_v50 }
  0x6b   : > { %1304 = vmatprep.subr.bf16.mxu1 %v1641_v0  ;;  %1376 = vmatprep.subr.bf16.mxu0 %v1641_v0  ;;  %v1395_v59 = vpack.c.bf16 %v368_v17, %v361_v16  ;;  %v377_v60 = vand.u32 4294901760, %v376_v52  ;;  %v1323_v2 = vpack.c.bf16 %v370_v39, %v363_v35  ;;  %v410_v43 = vand.u32 4294901760, %v1975_v34 }
  0x6c   : > { %v384_v3 = vand.u32 4294901760, %v383_v55  ;;  %v397_v4 = vsub.f32 %v1959_v20, %v396_v36  ;;  %v1398_v44 = vpack.c.bf16 %v382_v33, %v375_v25  ;;  %v424_v11 = vand.u32 4294901760, %v1995_v56 }
  0x6d   : > { %v411_v10 = vsub.f32 %v1975_v34, %v410_v43 }
  0x6e   : > { %1306 = vmatpush3.bf16.msra.mxu1 %v1886_v41  ;;  %1378 = vmatpush3.bf16.msra.mxu0 %v1886_v41  ;;  %v398_v9 = vand.u32 4294901760, %v397_v4  ;;  %v425_v22 = vsub.f32 %v1995_v56, %v424_v11 }
  0x6f   : > { %1307 = vmatprep.subr.bf16.mxu1 %v1641_v0  ;;  %1379 = vmatprep.subr.bf16.mxu0 %v1641_v0  ;;  %v412_v17 = vand.u32 4294901760, %v411_v10 }
  0x70   : > { %v426_v45 = vand.u32 4294901760, %v425_v22 }
  0x72   : > { %1309 = vmatpush3.bf16.msra.mxu1 %v1911_v53  ;;  %1381 = vmatpush3.bf16.msra.mxu0 %v1911_v53 }
  0x73   : > { %1310 = vmatprep.subr.bf16.mxu1 %v1641_v0  ;;  %1382 = vmatprep.subr.bf16.mxu0 %v1641_v0 }
  0x76   : > { %1312 = vmatpush3.bf16.msra.mxu1 %v1932_v63  ;;  %1384 = vmatpush3.bf16.msra.mxu0 %v1932_v63 }
  0x77   : > { %1313 = vmatprep.subr.bf16.mxu1 %v1641_v0  ;;  %1385 = vmatprep.subr.bf16.mxu0 %v1641_v0 }
  0x79   : > { %1112 = vmatmul.mubr.f32.vlgmr.msra.gmra.mrb[0].mxu1 %v310_v8  ;;  %1217 = vmatmul.mubr.f32.vlgmr.msra.gmra.mrb[0].mxu0 %v308_v51  ;;  %v1392_v51 = vpack.c.bf16 %v354_v62, %v347_v61  ;;  %v390_v61 = vsub.f32 %v1954_v19, %v389_v54  ;;  %v403_v62 = vand.u32 4294901760, %v1970_v28  ;;  %v1326_v8 = vpack.c.bf16 %v384_v3, %v377_v60 }
  0x7a   : > { %1315 = vmatpush3.bf16.msra.mxu1 %v1314_v14  ;;  %1387 = vmatpush3.bf16.msra.mxu0 %v1386_v7  ;;  %v417_v7 = vand.u32 4294901760, %v1990_v42  ;;  %v1401_v14 = vpack.c.bf16 %v396_v36, %v389_v54 }
  0x7b   : > { %1316 = vmatprep.subr.bf16.mxu1 %v1641_v0  ;;  %1388 = vmatprep.subr.bf16.mxu0 %v1641_v0  ;;  %v391_v49 = vand.u32 4294901760, %v390_v61  ;;  %v404_v50 = vsub.f32 %v1970_v28, %v403_v62  ;;  %v1404_v25 = vpack.c.bf16 %v410_v43, %v403_v62 }
  0x7c   : > { %1146 = vmatprep.mubr.msk.f32.mxu1 %vm1642_vm0, %v1643_v1  ;;  %1251 = vmatprep.mubr.msk.f32.mxu0 %vm1642_vm0, %v1643_v1  ;;  %v1407_v33 = vpack.c.bf16 %v424_v11, %v417_v7 }
  0x7d   : > { %v405_v15 = vand.u32 4294901760, %v404_v50  ;;  %v1329_v16 = vpack.c.bf16 %v398_v9, %v391_v49 }
  0x7e   : > { %1318 = vmatpush3.bf16.msra.mxu1 %v1317_v26  ;;  %1390 = vmatpush3.bf16.msra.mxu0 %v1389_v21  ;;  %v418_v21 = vsub.f32 %v1990_v42, %v417_v7 }
  0x7f   : > { %1319 = vmatprep.subr.bf16.mxu1 %v1641_v0  ;;  %1391 = vmatprep.subr.bf16.mxu0 %v1641_v0  ;;  %v1332_v24 = vpack.c.bf16 %v412_v17, %v405_v15 }
  0x80   : > { %v419_v26 = vand.u32 4294901760, %v418_v21 }
  0x82   : > { %1321 = vmatpush3.bf16.msra.mxu1 %v1320_v46  ;;  %1393 = vmatpush3.bf16.msra.mxu0 %v1392_v51  ;;  %v1335_v27 = vpack.c.bf16 %v426_v45, %v419_v26  ;;  %v1338_v46 = vpack.c.bf16 %v1858_v31, %v1854_v29  ;;  %v1341_v51 = vpack.c.bf16 %v1874_v38, %v1872_v37  ;;  %v972_v31 = vld [vmem:[%s2120_s2] ss:$0 sm:$0xff] }
  0x83   : > { %1322 = vmatprep.subr.bf16.mxu1 %v1641_v0  ;;  %1394 = vmatprep.subr.bf16.mxu0 %v1641_v0  ;;  %v1344_v29 = vpack.c.bf16 %v1899_v48, %v1897_v47 }
  0x86   : > { %1324 = vmatpush3.bf16.msra.mxu1 %v1323_v2  ;;  %1396 = vmatpush3.bf16.msra.mxu0 %v1395_v59 }
  0x87   : > { %1325 = vmatprep.subr.bf16.mxu1 %v1641_v0  ;;  %1397 = vmatprep.subr.bf16.mxu0 %v1641_v0 }
  0x8a   : > { %1327 = vmatpush3.bf16.msra.mxu1 %v1326_v8  ;;  %1399 = vmatpush3.bf16.msra.mxu0 %v1398_v44 }
  0x8b   : > { %1328 = vmatprep.subr.bf16.mxu1 %v1641_v0  ;;  %1400 = vmatprep.subr.bf16.mxu0 %v1641_v0 }
  0x8e   : > { %1330 = vmatpush3.bf16.msra.mxu1 %v1329_v16  ;;  %1402 = vmatpush3.bf16.msra.mxu0 %v1401_v14 }
  0x8f   : > { %1331 = vmatprep.subr.bf16.mxu1 %v1641_v0  ;;  %1403 = vmatprep.subr.bf16.mxu0 %v1641_v0 }
  0x92   : > { %1333 = vmatpush3.bf16.msra.mxu1 %v1332_v24  ;;  %1405 = vmatpush3.bf16.msra.mxu0 %v1404_v25 }
  0x93   : > { %1334 = vmatprep.subr.bf16.mxu1 %v1641_v0  ;;  %1406 = vmatprep.subr.bf16.mxu0 %v1641_v0 }
  0x96   : > { %1336 = vmatpush3.bf16.msra.mxu1 %v1335_v27  ;;  %1408 = vmatpush3.bf16.msra.mxu0 %v1407_v33 }
  0x97   : > { %1337 = vmatprep.subr.bf16.mxu1 %v1641_v0  ;;  %1409 = vmatprep.subr.bf16.mxu0 %v1641_v0 }
  0x99   : > { %1147 = vmatmul.mubr.f32.vlgmr.msra.gmra.mrb[0].mxu1 %v1856_v30  ;;  %1252 = vmatmul.mubr.f32.vlgmr.msra.gmra.mrb[0].mxu0 %v1856_v30 }
  0x9a   : > { %1339 = vmatpush3.bf16.msra.mxu1 %v1338_v46  ;;  %1411 = vmatpush3.bf16.msra.mxu0 %v1823_v12  ;;  %v1347_v12 = vpack.c.bf16 %v1920_v58, %v1918_v57 }
  0x9b   : > { %1340 = vmatprep.subr.bf16.mxu1 %v1641_v0  ;;  %1412 = vmatprep.subr.bf16.mxu0 %v1641_v0 }
  0x9c   : > { %1181 = vmatprep.mubr.msk.f32.mxu1 %vm1642_vm0, %v1643_v1  ;;  %1286 = vmatprep.mubr.msk.f32.mxu0 %vm1642_vm0, %v1643_v1  ;;  %v1350_v1 = vpack.c.bf16 %v1941_v6, %v1938_v5 }
  0x9e   : > { %1342 = vmatpush3.bf16.msra.mxu1 %v1341_v51  ;;  %1414 = vmatpush3.bf16.msra.mxu0 %v1827_v13  ;;  %v1353_v13 = vpack.c.bf16 %v1959_v20, %v1954_v19 }
  0x9f   : > { %1343 = vmatprep.subr.bf16.mxu1 %v1641_v0  ;;  %1415 = vmatprep.subr.bf16.mxu0 %v1641_v0 }
  0xa2   : > { %1345 = vmatpush3.bf16.msra.mxu1 %v1344_v29  ;;  %1417 = vmatpush3.bf16.msra.mxu0 %v1833_v18  ;;  %v1356_v18 = vpack.c.bf16 %v1975_v34, %v1970_v28 }
  0xa3   : > { %1346 = vmatprep.subr.bf16.mxu1 %v1641_v0  ;;  %1418 = vmatprep.subr.bf16.mxu0 %v1641_v0 }
  0xa6   : > { %1348 = vmatpush3.bf16.msra.mxu1 %v1347_v12  ;;  %1420 = vmatpush3.bf16.msra.mxu0 %v1843_v23  ;;  %v1359_v23 = vpack.c.bf16 %v1995_v56, %v1990_v42 }
  0xa7   : > { %1349 = vmatprep.subr.bf16.mxu1 %v1641_v0  ;;  %1421 = vmatprep.subr.bf16.mxu0 %v1641_v0 }
  0xaa   : > { %1351 = vmatpush3.bf16.msra.mxu1 %v1350_v1  ;;  %1423 = vmatpush3.bf16.msra.mxu0 %v1862_v32 }
  0xab   : > { %1352 = vmatprep.subr.bf16.mxu1 %v1641_v0  ;;  %1424 = vmatprep.subr.bf16.mxu0 %v1641_v0 }
  0xae   : > { %1354 = vmatpush3.bf16.msra.mxu1 %v1353_v13  ;;  %1426 = vmatpush3.bf16.msra.mxu0 %v1886_v41 }
  0xaf   : > { %1355 = vmatprep.subr.bf16.mxu1 %v1641_v0  ;;  %1427 = vmatprep.subr.bf16.mxu0 %v1641_v0 }
  0xb2   : > { %1357 = vmatpush3.bf16.msra.mxu1 %v1356_v18  ;;  %1429 = vmatpush3.bf16.msra.mxu0 %v1911_v53 }
  0xb3   : > { %1358 = vmatprep.subr.bf16.mxu1 %v1641_v0  ;;  %1430 = vmatprep.subr.bf16.mxu0 %v1641_v0 }
  0xb6   : > { %1360 = vmatpush3.bf16.msra.mxu1 %v1359_v23  ;;  %1432 = vmatpush3.bf16.msra.mxu0 %v1932_v63 }
  0xb9   : > { %1182 = vmatmul.mubr.f32.vlgmr.msra.gmra.mrb[0].mxu1 %v1878_v40  ;;  %1287 = vmatmul.mubr.f32.vlgmr.msra.gmra.mrb[0].mxu0 %v1856_v30 }
 0x18c   : > { %v567_v32 = vpop.f32.mrb[0].mxu1  ;;  %v862_v37 = vpop.f32.mrb[0].mxu0 }
 0x18d   : > { %v1433_v38 = vadd.f32 %v972_v31, %v567_v32  ;;  %v1183_v41 = vpop.f32.mrb[1].mxu1  ;;  %v1288_v47 = vpop.f32.mrb[1].mxu0 }
 0x18f   : > { %v1434_v48 = vadd.f32 %v1433_v38, %v862_v37 }
 0x191   : > { %1505 = vtanh.f32 %v1434_v48 }
 0x19b   : > { %v1506_v0 = vpop.eup %1505 }
 0x19c   : > { %867 = vst [vmem:[%s200_s25] sm:$0xff] %v1506_v0 }
 0x19d   : > { %1578 = shalt.err (!%p1575_p7)
}
 0x19e   : > { %s1579_s29 = scalar_lea.hbm %s2074_s9, 128  ;;  %s1583_s22 = scalar_lea.hbm %s2121_s3, 256 }
 0x19f   : > { %p1580_p9 = scmp.ne.s32.totalorder %s2074_s9, %s1579_s29  ;;  %p1584_p0 = scmp.lt.u32.totalorder %s2074_s9, %s2121_s3 }
 0x1a0   : > { %p1585_p11 = scmp.lt.u32.totalorder %s1583_s22, %s1579_s29  ;;  %p1587_p4 = scmp.lt.u32.totalorder %s1579_s29, %s2074_s9 }
 0x1a1   : > { %p1581_p2 = pnand %p1580_p9, %p1756_p12 }
 0x1a2   : > { %p1586_p1 = por %p1585_p11, %p1584_p0 }
 0x1a3   : > { %p1582_p5 = pneg %p1581_p2 }
 0x1a4   : > { %p1588_p6 = por %p1587_p4, %p1586_p1 }
 0x1a6   : > { %p1589_p8 = pnand %p1588_p6, %p1582_p5 }
 0x1a8   : > { %1592 = shalt.err (!%p1589_p8)
}
 0x1a9   : > { %1449 = dma.vmem_to_hbm [thread:$0]  (%p1756_p12), %s2076_s26, 128, %s2074_s9, %s869_s10  }
 0x1aa PF: > { %s894_s18 = sand.u32 1, %s1623_s12   ;;  %p2136_p10 = scmp.ne.s32.totalorder %s2126_s19, 0 }
 0x1ab   : > { %p2137_p13 = scmp.ge.s32.totalorder %s1635_s15, 2  ;;  %s895_s20 = scalar_lea.sflag [#allocation4], %s894_s18 }
 0x1ad   : > { %p1460_p3 = pnand %p2137_p13, %p2136_p10 }
 0x1af   : > { %1618 = dma.done.wait (!%p1460_p3), %s895_s20, 128  }
 0x1b0   : > { %1620 = vsyncadd (!%p1460_p3), %s895_s20, 4294967168  ;;  %p17_p7 = scmp.ge.s32.totalorder %s1721_s24, 4   ;;  %s2138_s12 = smov %s1627_s13 }
 0x1b1   : > { %s2139_s13 = smov %s1631_s14  ;;  %s2140_s14 = smov %s1752_s17 }
 0x1b2   : > { %s2141_s15 = smov %s1721_s24  ;;  %19 = sbr.rel (!%p17_p7) target bundleno = 6 (0x6), region = 81 }
 0x1b9   :  { %900 = vsyncpa [#allocation3], 1 }
 0x1ba   :  { %902 = vsyncpa [#allocation3 + $0x1], 1 }
 0x1bb   :  { %903 = vsyncpa [#allocation6], 1 }
 0x1bc   :  { %904 = vsyncpa [#allocation4], 1 }
 0x1bd   :  { %906 = vsyncpa [#allocation4 + $0x1], 1 }

</bundles_post_ra>
